<compile_context>
chip_gen: v7x
topology: tpu7x:2x2x1
jax: 0.10.0
libtpu: 0.0.40
codegen_flags: <defaults>
</compile_context>

<pallas_src>
import functools

import jax
import jax.numpy as jnp
from jax.experimental import pallas as pl
from jax.experimental.pallas import tpu as pltpu


def _round_up(x, m):
    return (x + m - 1) // m * m


def mlp_kernel(alpha_ref,                 # SMEM (2,) f32 : PReLU alphas
               x_ref,                     # (TB, D_in)           f32
               w1_ref, b1_ref,            # (D_in, H1p) bf16 , (1, H1p) f32
               w2_ref, b2_ref,            # (H1p,  H2p) bf16 , (1, H2p) f32
               w3_ref, b3_ref,            # (H2p,  Lp ) bf16 , (1, Lp ) f32
               o_ref):                    # (TB, Lp)             f32
    # Layer 1: Linear + PReLU (bf16 MXU matmul, f32 accumulation).
    h = jnp.dot(x_ref[...].astype(jnp.bfloat16), w1_ref[...],
                preferred_element_type=jnp.float32) + b1_ref[...]
    h = jnp.where(h >= 0.0, h, alpha_ref[0] * h)

    # Layer 2: Linear + PReLU.
    h = jnp.dot(h.astype(jnp.bfloat16), w2_ref[...],
                preferred_element_type=jnp.float32) + b2_ref[...]
    h = jnp.where(h >= 0.0, h, alpha_ref[1] * h)

    # Layer 3: latent projection (lane-dense, 128-padded output columns).
    out = jnp.dot(h.astype(jnp.bfloat16), w3_ref[...],
                  preferred_element_type=jnp.float32) + b3_ref[...]
    o_ref[...] = out.astype(o_ref.dtype)


@functools.partial(jax.jit, static_argnames=("tb",))
def embedding_net_forward(x, params, *, tb=2048):
    """Fused forward pass of EmbeddingNet. x: (B, D_in) f32 -> (B, D_lat) f32."""
    w1, b1, a1, w2, b2, a2, w3, b3 = params
    B, d_in = x.shape
    d_h1, d_h2, d_lat = w1.shape[1], w2.shape[1], w3.shape[1]

    # Lane-dense (128-padded) feature widths for all layer outputs.
    h1p = _round_up(max(d_h1, 128), 128)
    h2p = _round_up(max(d_h2, 128), 128)
    lp = _round_up(max(d_lat, 128), 128)

    # Batch tile: multiple of 8 sublanes, capped by the (8-padded) batch.
    tb = max(8, (tb // 8) * 8)
    TB = min(tb, _round_up(B, 8))
    B_pad = _round_up(B, TB)
    if B_pad != B:
        x = jnp.pad(x, ((0, B_pad - B), (0, 0)))

    # Zero-pad weights / biases to the lane-dense widths (numerically neutral:
    # padded columns produce 0, PReLU(0)=0, padded w3 rows multiply zeros).
    w1_bf = jnp.pad(w1, ((0, 0), (0, h1p - d_h1))).astype(jnp.bfloat16)
    w2_bf = jnp.pad(w2, ((0, h1p - d_h1), (0, h2p - d_h2))).astype(jnp.bfloat16)
    w3_bf = jnp.pad(w3, ((0, h2p - d_h2), (0, lp - d_lat))).astype(jnp.bfloat16)
    b1_r = jnp.pad(b1, (0, h1p - d_h1)).reshape(1, -1).astype(jnp.float32)
    b2_r = jnp.pad(b2, (0, h2p - d_h2)).reshape(1, -1).astype(jnp.float32)
    b3_r = jnp.pad(b3, (0, lp - d_lat)).reshape(1, -1).astype(jnp.float32)
    alphas = jnp.concatenate([a1, a2]).astype(jnp.float32)      # (2,) scalar prefetch

    grid = (B_pad // TB,)

    grid_spec = pltpu.PrefetchScalarGridSpec(
        num_scalar_prefetch=1,
        grid=grid,
        in_specs=[
            pl.BlockSpec((TB, d_in), lambda i, alphas_ref: (i, 0)),   # x tile (pipelined)
            pl.BlockSpec((d_in, h1p), lambda i, alphas_ref: (0, 0)),  # w1 (VMEM-resident)
            pl.BlockSpec((1, h1p), lambda i, alphas_ref: (0, 0)),     # b1
            pl.BlockSpec((h1p, h2p), lambda i, alphas_ref: (0, 0)),   # w2
            pl.BlockSpec((1, h2p), lambda i, alphas_ref: (0, 0)),     # b2
            pl.BlockSpec((h2p, lp), lambda i, alphas_ref: (0, 0)),    # w3
            pl.BlockSpec((1, lp), lambda i, alphas_ref: (0, 0)),      # b3
        ],
        out_specs=pl.BlockSpec((TB, lp), lambda i, alphas_ref: (i, 0)),
    )

    flops = 2 * B_pad * (d_in * h1p + h1p * h2p + h2p * lp)
    bytes_accessed = (
        B_pad * d_in * 4                                  # x (f32)
        + B_pad * lp * 4                                  # out (f32)
        + (d_in * h1p + h1p * h2p + h2p * lp) * 2         # weights (bf16)
        + (h1p + h2p + lp) * 4                            # biases (f32)
        + 2 * 4)                                          # alphas

    out = pl.pallas_call(
        mlp_kernel,
        out_shape=jax.ShapeDtypeStruct((B_pad, lp), jnp.float32),
        grid_spec=grid_spec,
        compiler_params=pltpu.CompilerParams(
            dimension_semantics=("parallel",)),
        cost_estimate=pl.CostEstimate(
            flops=flops, transcendentals=0, bytes_accessed=bytes_accessed),
    )(alphas, x, w1_bf, b1_r, w2_bf, b2_r, w3_bf, b3_r)

    return out[:B, :d_lat]


def init_params(key, d_in, d_h1, d_h2, d_latent):
    """nn.Linear-style init (uniform +-1/sqrt(fan_in)), nn.PReLU default alpha=0.25.
    Weights stored pre-transposed as (fan_in, fan_out)."""
    ks = jax.random.split(key, 6)

    def linear(kw, kb, fan_in, fan_out):
        bound = 1.0 / jnp.sqrt(jnp.float32(fan_in))
        w = jax.random.uniform(kw, (fan_in, fan_out), jnp.float32, -bound, bound)
        b = jax.random.uniform(kb, (fan_out,), jnp.float32, -bound, bound)
        return w, b

    w1, b1 = linear(ks[0], ks[1], d_in, d_h1)
    w2, b2 = linear(ks[2], ks[3], d_h1, d_h2)
    w3, b3 = linear(ks[4], ks[5], d_h2, d_latent)
    a1 = jnp.array([0.25], jnp.float32)
    a2 = jnp.array([0.25], jnp.float32)
    return (w1, b1, a1, w2, b2, a2, w3, b3)


def reference_forward_f32(x, params):
    """Pure-f32 reference (PyTorch-equivalent math)."""
    w1, b1, a1, w2, b2, a2, w3, b3 = params
    h = x @ w1 + b1
    h = jnp.where(h >= 0, h, a1[0] * h)
    h = h @ w2 + b2
    h = jnp.where(h >= 0, h, a2[0] * h)
    return h @ w3 + b3


def reference_forward_mixed(x, params):
    """Same bf16-input / f32-accumulate recipe as the kernel (tight-tolerance check)."""
    w1, b1, a1, w2, b2, a2, w3, b3 = params
    bf = jnp.bfloat16
    h = jnp.dot(x.astype(bf), w1.astype(bf), preferred_element_type=jnp.float32) + b1
    h = jnp.where(h >= 0, h, a1[0] * h)
    h = jnp.dot(h.astype(bf), w2.astype(bf), preferred_element_type=jnp.float32) + b2
    h = jnp.where(h >= 0, h, a2[0] * h)
    return jnp.dot(h.astype(bf), w3.astype(bf), preferred_element_type=jnp.float32) + b3


if __name__ == "__main__":
    # nn_config: units_1st_layer=32, units_2nd_layer=64, units_3rd_layer=48, units_latent_layer=16
    B, D_IN, D_H1, D_H2, D_LAT = 8, 32, 64, 48, 16

    key = jax.random.PRNGKey(0)
    kx, kp = jax.random.split(key)
    x = jax.random.normal(kx, (B, D_IN), jnp.float32)
    params = init_params(kp, D_IN, D_H1, D_H2, D_LAT)

    out = embedding_net_forward(x, params)
    out = jax.block_until_ready(out)
    assert out.shape == (B, D_LAT)

    # Tight check vs a reference using the same bf16-input / f32-accum recipe.
    ref_mixed = reference_forward_mixed(x, params)
    assert jnp.allclose(out, ref_mixed, atol=2e-3, rtol=2e-3), \
        "mismatch vs mixed-precision reference"

    # Looser check vs the pure-f32 PyTorch-equivalent math (bf16 inputs cost ~3 decimal digits).
    ref_f32 = reference_forward_f32(x, params)
    assert jnp.allclose(out, ref_f32, atol=5e-2, rtol=5e-2), \
        "mismatch vs f32 reference"

    print("KERNEL_OK")
</pallas_src>

<mosaic_0001>
module attributes {stable_mosaic.version = 11 : i64} {
  func.func @mlp_kernel(%arg0: i32, %arg1: memref<2xf32, #tpu.memory_space<smem>>, %arg2: memref<8x32xf32, #tpu.memory_space<vmem>>, %arg3: memref<32x128xbf16, #tpu.memory_space<vmem>>, %arg4: memref<1x128xf32, #tpu.memory_space<vmem>>, %arg5: memref<128x128xbf16, #tpu.memory_space<vmem>>, %arg6: memref<1x128xf32, #tpu.memory_space<vmem>>, %arg7: memref<128x128xbf16, #tpu.memory_space<vmem>>, %arg8: memref<1x128xf32, #tpu.memory_space<vmem>>, %arg9: memref<8x128xf32, #tpu.memory_space<vmem>>) attributes {dimension_semantics = [#tpu.dimension_semantics<parallel>], iteration_bounds = array<i64: 1>, scalar_prefetch = 1 : i64, scratch_operands = 0 : i64, tpu.core_type = #tpu.core_type<tc>, window_params = [{transform_indices = @transform_0, window_bounds = array<i64: 8, 32>}, {pipeline_mode = #tpu.pipeline_mode<synchronous>, transform_indices = @transform_1, window_bounds = array<i64: 32, 128>}, {pipeline_mode = #tpu.pipeline_mode<synchronous>, transform_indices = @transform_2, window_bounds = array<i64: 1, 128>}, {pipeline_mode = #tpu.pipeline_mode<synchronous>, transform_indices = @transform_3, window_bounds = array<i64: 128, 128>}, {pipeline_mode = #tpu.pipeline_mode<synchronous>, transform_indices = @transform_4, window_bounds = array<i64: 1, 128>}, {pipeline_mode = #tpu.pipeline_mode<synchronous>, transform_indices = @transform_5, window_bounds = array<i64: 128, 128>}, {pipeline_mode = #tpu.pipeline_mode<synchronous>, transform_indices = @transform_6, window_bounds = array<i64: 1, 128>}, {transform_indices = @transform_7, window_bounds = array<i64: 8, 128>}]} {
    %c0 = arith.constant 0 : index
    %c0_0 = arith.constant 0 : index
    %0 = vector.load %arg2[%c0, %c0_0] : memref<8x32xf32, #tpu.memory_space<vmem>>, vector<8x32xf32>
    %1 = arith.truncf %0 : vector<8x32xf32> to vector<8x32xbf16>
    %c0_1 = arith.constant 0 : index
    %c0_2 = arith.constant 0 : index
    %2 = vector.load %arg3[%c0_1, %c0_2] : memref<32x128xbf16, #tpu.memory_space<vmem>>, vector<32x128xbf16>
    %cst = arith.constant dense<0.000000e+00> : vector<8x128xf32>
    %3 = tpu.matmul %1, %2, %cst {dimension_numbers = #tpu.dot_dimension_numbers<[1], [0], [0], [1], [0, 0, 1, 1], [], []>} : vector<8x32xbf16>, vector<32x128xbf16>, vector<8x128xf32> -> vector<8x128xf32>
    %c0_3 = arith.constant 0 : index
    %c0_4 = arith.constant 0 : index
    %4 = vector.load %arg4[%c0_3, %c0_4] : memref<1x128xf32, #tpu.memory_space<vmem>>, vector<1x128xf32>
    %5 = vector.broadcast %4 : vector<1x128xf32> to vector<8x128xf32>
    %6 = arith.addf %3, %5 : vector<8x128xf32>
    %cst_5 = arith.constant 0.000000e+00 : f32
    %7 = vector.broadcast %cst_5 : f32 to vector<8x128xf32>
    %8 = arith.cmpf oge, %6, %7 : vector<8x128xf32>
    %c0_6 = arith.constant 0 : index
    %9 = memref.load %arg1[%c0_6] : memref<2xf32, #tpu.memory_space<smem>>
    %10 = vector.broadcast %9 : f32 to vector<8x128xf32>
    %11 = arith.mulf %10, %6 : vector<8x128xf32>
    %12 = arith.select %8, %6, %11 : vector<8x128xi1>, vector<8x128xf32>
    %13 = arith.truncf %12 : vector<8x128xf32> to vector<8x128xbf16>
    %c0_7 = arith.constant 0 : index
    %c0_8 = arith.constant 0 : index
    %14 = vector.load %arg5[%c0_7, %c0_8] : memref<128x128xbf16, #tpu.memory_space<vmem>>, vector<128x128xbf16>
    %cst_9 = arith.constant dense<0.000000e+00> : vector<8x128xf32>
    %15 = tpu.matmul %13, %14, %cst_9 {dimension_numbers = #tpu.dot_dimension_numbers<[1], [0], [0], [1], [0, 0, 1, 1], [], []>} : vector<8x128xbf16>, vector<128x128xbf16>, vector<8x128xf32> -> vector<8x128xf32>
    %c0_10 = arith.constant 0 : index
    %c0_11 = arith.constant 0 : index
    %16 = vector.load %arg6[%c0_10, %c0_11] : memref<1x128xf32, #tpu.memory_space<vmem>>, vector<1x128xf32>
    %17 = vector.broadcast %16 : vector<1x128xf32> to vector<8x128xf32>
    %18 = arith.addf %15, %17 : vector<8x128xf32>
    %cst_12 = arith.constant 0.000000e+00 : f32
    %19 = vector.broadcast %cst_12 : f32 to vector<8x128xf32>
    %20 = arith.cmpf oge, %18, %19 : vector<8x128xf32>
    %c1 = arith.constant 1 : index
    %21 = memref.load %arg1[%c1] : memref<2xf32, #tpu.memory_space<smem>>
    %22 = vector.broadcast %21 : f32 to vector<8x128xf32>
    %23 = arith.mulf %22, %18 : vector<8x128xf32>
    %24 = arith.select %20, %18, %23 : vector<8x128xi1>, vector<8x128xf32>
    %25 = arith.truncf %24 : vector<8x128xf32> to vector<8x128xbf16>
    %c0_13 = arith.constant 0 : index
    %c0_14 = arith.constant 0 : index
    %26 = vector.load %arg7[%c0_13, %c0_14] : memref<128x128xbf16, #tpu.memory_space<vmem>>, vector<128x128xbf16>
    %cst_15 = arith.constant dense<0.000000e+00> : vector<8x128xf32>
    %27 = tpu.matmul %25, %26, %cst_15 {dimension_numbers = #tpu.dot_dimension_numbers<[1], [0], [0], [1], [0, 0, 1, 1], [], []>} : vector<8x128xbf16>, vector<128x128xbf16>, vector<8x128xf32> -> vector<8x128xf32>
    %c0_16 = arith.constant 0 : index
    %c0_17 = arith.constant 0 : index
    %28 = vector.load %arg8[%c0_16, %c0_17] : memref<1x128xf32, #tpu.memory_space<vmem>>, vector<1x128xf32>
    %29 = vector.broadcast %28 : vector<1x128xf32> to vector<8x128xf32>
    %30 = arith.addf %27, %29 : vector<8x128xf32>
    %c0_18 = arith.constant 0 : index
    %c0_19 = arith.constant 0 : index
    %31 = vector.load %arg9[%c0_18, %c0_19] : memref<8x128xf32, #tpu.memory_space<vmem>>, vector<8x128xf32>
    tpu.vector_store %arg9[%c0_18, %c0_19], %30 {strides = array<i32>} : memref<8x128xf32, #tpu.memory_space<vmem>>, vector<8x128xf32>,
    return
  }
  func.func @transform_0(%arg0: i32, %arg1: memref<2xf32, #tpu.memory_space<smem>>) -> (i32, i32) {
    %c0_i32 = arith.constant 0 : i32
    %c0_i32_0 = arith.constant 0 : i32
    return %arg0, %c0_i32 : i32, i32
  }
  func.func @transform_1(%arg0: i32, %arg1: memref<2xf32, #tpu.memory_space<smem>>) -> (i32, i32) {
    %c0_i32 = arith.constant 0 : i32
    %c0_i32_0 = arith.constant 0 : i32
    %c0_i32_1 = arith.constant 0 : i32
    return %c0_i32, %c0_i32_0 : i32, i32
  }
  func.func @transform_2(%arg0: i32, %arg1: memref<2xf32, #tpu.memory_space<smem>>) -> (i32, i32) {
    %c0_i32 = arith.constant 0 : i32
    %c0_i32_0 = arith.constant 0 : i32
    %c0_i32_1 = arith.constant 0 : i32
    return %c0_i32, %c0_i32_0 : i32, i32
  }
  func.func @transform_3(%arg0: i32, %arg1: memref<2xf32, #tpu.memory_space<smem>>) -> (i32, i32) {
    %c0_i32 = arith.constant 0 : i32
    %c0_i32_0 = arith.constant 0 : i32
    %c0_i32_1 = arith.constant 0 : i32
    return %c0_i32, %c0_i32_0 : i32, i32
  }
  func.func @transform_4(%arg0: i32, %arg1: memref<2xf32, #tpu.memory_space<smem>>) -> (i32, i32) {
    %c0_i32 = arith.constant 0 : i32
    %c0_i32_0 = arith.constant 0 : i32
    %c0_i32_1 = arith.constant 0 : i32
    return %c0_i32, %c0_i32_0 : i32, i32
  }
  func.func @transform_5(%arg0: i32, %arg1: memref<2xf32, #tpu.memory_space<smem>>) -> (i32, i32) {
    %c0_i32 = arith.constant 0 : i32
    %c0_i32_0 = arith.constant 0 : i32
    %c0_i32_1 = arith.constant 0 : i32
    return %c0_i32, %c0_i32_0 : i32, i32
  }
  func.func @transform_6(%arg0: i32, %arg1: memref<2xf32, #tpu.memory_space<smem>>) -> (i32, i32) {
    %c0_i32 = arith.constant 0 : i32
    %c0_i32_0 = arith.constant 0 : i32
    %c0_i32_1 = arith.constant 0 : i32
    return %c0_i32, %c0_i32_0 : i32, i32
  }
  func.func @transform_7(%arg0: i32, %arg1: memref<2xf32, #tpu.memory_space<smem>>) -> (i32, i32) {
    %c0_i32 = arith.constant 0 : i32
    %c0_i32_0 = arith.constant 0 : i32
    return %arg0, %c0_i32 : i32, i32
  }
}

</mosaic_0001>

<bundles_post_ra>
// kernel: embedding_net_forward.1
= control target key start
LH: loop header
LB: loop body
LE: loop exit
PB: predicated region body
PF: predicated region fallthrough
CT: control target
= control target key end

     0   :  { %s659_s0 = inlined_call_operand.vmem [shape: f32[2], index: 0, kind: input, shape index: {}]   ;;  %s660_s1 = inlined_call_operand.vmem [shape: f32[8,32], index: 1, kind: input, shape index: {}]   ;;  %s661_s2 = inlined_call_operand.vmem [shape: bf16[32,128], index: 2, kind: input, shape index: {}]   ;;  %s662_s3 = inlined_call_operand.vmem [shape: f32[1,128], index: 3, kind: input, shape index: {}]   ;;  %s663_s4 = inlined_call_operand.vmem [shape: bf16[128,128], index: 4, kind: input, shape index: {}]   ;;  %s664_s5 = inlined_call_operand.vmem [shape: f32[1,128], index: 5, kind: input, shape index: {}]   ;;  %s665_s6 = inlined_call_operand.vmem [shape: bf16[128,128], index: 6, kind: input, shape index: {}]   ;;  %s666_s7 = inlined_call_operand.vmem [shape: f32[1,128], index: 7, kind: input, shape index: {}]   ;;  %s667_s8 = inlined_call_operand.hbm [shape: f32[8,128], index: 8, kind: output, shape index: {}]  }
   0x1   :  { %s13_s29 = sshll.u32 %s659_s0, 4  ;;  %s14_s29 = int_to_ptr.vmem [resolvable:$true] %s13_s29 }
   0x2   :  { %s467_s30 = scalar_lea.vmem %s14_s29, 16  ;;  %p472_p1 = scmp.lt.s32.totalorder %s14_s29, %s14_s29 }
   0x3   :  { %p468_p0 = scmp.ne.s32.totalorder %s14_s29, %s467_s30  ;;  %p473_p2 = scmp.lt.s32.totalorder %s467_s30, %s467_s30 }
   0x5   :  { %p474_p3 = por %p473_p2, %p472_p1 }
   0x7   :  { %p475_p4 = pnand %p474_p3, %p468_p0 }
   0x9   :  { %478 = shalt.err (!%p475_p4)  }
   0xa   :  { %s505_s9 = smov [#allocation3]  }
   0xb   :  { %16 = dma.vmem_to_smem %s14_s29, 16, %s505_s9, [#allocation2] }
   0xc   :  { %501 = dma.done.wait [#allocation2], 16 }
   0xd   :  { %502 = vsyncadd [#allocation2], 4294967280 }
   0xe   :  { %18 = sfence }
   0xf   :  { %v449_v0 = vld [vmem:[%s661_s2] sm:$0xff]   ;;  %v506_v1 = vmov 0.0   ;;  %v450_v2 = vld [vmem:[%s661_s2 + $0x8] sm:$0xff]   ;;  %vm507_vm0 = vmmov 0   ;;  %vm60_vm1 = vcmask 261120   ;;  %v453_v7 = vld [vmem:[%s663_s4 + $0x10] sm:$0xff]  }
  0x10   :  { %397 = vmatprep.subr.bf16.mxu0 %v506_v1  ;;  %405 = vmatprep.subr.bf16.mxu1 %v506_v1  ;;  %v35_v3 = vld [vmem:[%s660_s1] sm:$0xff]  ;;  %v452_v6 = vld [vmem:[%s663_s4 + $0x8] sm:$0xff]   ;;  %v454_v8 = vld [vmem:[%s663_s4 + $0x18] sm:$0xff]  }
  0x11   :  { %398 = vmatpush3.bf16.msra.mxu0 %v449_v0  ;;  %401 = vmatprep.mubr.msk.bf16.mxu0 %vm507_vm0, %v506_v1  ;;  %v451_v4 = vld [vmem:[%s663_s4] sm:$0xff]   ;;  %v36_v5 = vpack.c.bf16 %v35_v3, %v35_v3 }
  0x12   :  { %399 = vmatprep.subr.bf16.mxu0 %v506_v1  ;;  %421 = vmatprep.mubr.msk.bf16.mxu1 %vm507_vm0, %v506_v1 }
  0x13   :  { %406 = vmatpush3.bf16.msra.mxu1 %v451_v4 }
  0x14   :  { %407 = vmatprep.subr.bf16.mxu1 %v506_v1 }
  0x15   :  { %400 = vmatpush3.bf16.msra.mxu0 %v450_v2 }
  0x16   :  { %425 = vmatprep.subr.bf16.mxu0 %v506_v1 }
  0x17   :  { %408 = vmatpush3.bf16.msra.mxu1 %v452_v6 }
  0x18   :  { %402 = vmatmul.mubr.msk.bf16.vlgmr.msra.gmra.mrb[0].mxu0 %vm60_vm1, %v36_v5  ;;  %409 = vmatprep.subr.bf16.mxu1 %v506_v1 }
  0x19   :  { %441 = vmatprep.mubr.msk.bf16.mxu0 %vm507_vm0, %v506_v1 }
  0x1b   :  { %410 = vmatpush3.bf16.msra.mxu1 %v453_v7 }
  0x1c   :  { %411 = vmatprep.subr.bf16.mxu1 %v506_v1 }
  0x1d   :  { %19 = vsyncpa [#allocation5], 0  ;;  %v455_v9 = vld [vmem:[%s663_s4 + $0x20] sm:$0xff]   ;;  %v456_v10 = vld [vmem:[%s663_s4 + $0x28] sm:$0xff]   ;;  %s105_s2 = sld [smem:[#allocation3]]  ;;  %s366_s21 = sld [smem:[#allocation3 + $0x1]] }
  0x1e   :  { %v457_v11 = vld [vmem:[%s663_s4 + $0x30] sm:$0xff]   ;;  %v458_v12 = vld [vmem:[%s663_s4 + $0x38] sm:$0xff]   ;;  %v459_v13 = vld [vmem:[%s665_s6] sm:$0xff]  }
  0x1f   :  { %412 = vmatpush3.bf16.msra.mxu1 %v454_v8  ;;  %426 = vmatpush3.bf16.msra.mxu0 %v459_v13  ;;  %v460_v14 = vld [vmem:[%s665_s6 + $0x8] sm:$0xff]   ;;  %v461_v15 = vld [vmem:[%s665_s6 + $0x10] sm:$0xff]   ;;  %v462_v16 = vld [vmem:[%s665_s6 + $0x18] sm:$0xff]  }
  0x20   :  { %413 = vmatprep.subr.bf16.mxu1 %v506_v1  ;;  %427 = vmatprep.subr.bf16.mxu0 %v506_v1  ;;  %v463_v17 = vld [vmem:[%s665_s6 + $0x20] sm:$0xff]   ;;  %v464_v18 = vld [vmem:[%s665_s6 + $0x28] sm:$0xff]   ;;  %v465_v29 = vld [vmem:[%s665_s6 + $0x30] sm:$0xff]  }
  0x21   :  { %v353_v19 = vld [vmem:[%s662_s3] ss:$0 sm:$0xff]  ;;  %v466_v30 = vld [vmem:[%s665_s6 + $0x38] sm:$0xff]   ;;  %s508_s6 = smov [#allocation4]  }
  0x22   :  { %v357_v31 = vld [vmem:[%s664_s5] ss:$0 sm:$0xff]  ;;  %s345_s26 = sshll.u32 %s508_s6, 4  ;;  %s346_s26 = int_to_ptr.vmem [resolvable:$true] %s345_s26 }
  0x23   :  { %414 = vmatpush3.bf16.msra.mxu1 %v455_v9  ;;  %428 = vmatpush3.bf16.msra.mxu0 %v460_v14  ;;  %v106_v21 = vstv %s105_s2  ;;  %v223_v33 = vstv %s366_s21  ;;  %v367_v41 = vld [vmem:[%s666_s7] ss:$0 sm:$0xff]  ;;  %s479_s5 = scalar_lea.vmem %s346_s26, 128  ;;  %p484_p6 = scmp.lt.s32.totalorder %s346_s26, %s346_s26 }
  0x24   :  { %415 = vmatprep.subr.bf16.mxu1 %v506_v1  ;;  %429 = vmatprep.subr.bf16.mxu0 %v506_v1  ;;  %p480_p5 = scmp.ne.s32.totalorder %s346_s26, %s479_s5  ;;  %p485_p7 = scmp.lt.s32.totalorder %s479_s5, %s479_s5 }
  0x26   :  { %p486_p8 = por %p485_p7, %p484_p6 }
  0x27   :  { %416 = vmatpush3.bf16.msra.mxu1 %v456_v10  ;;  %430 = vmatpush3.bf16.msra.mxu0 %v461_v15 }
  0x28   :  { %417 = vmatprep.subr.bf16.mxu1 %v506_v1  ;;  %431 = vmatprep.subr.bf16.mxu0 %v506_v1  ;;  %p487_p9 = pnand %p486_p8, %p480_p5 }
  0x2b   :  { %418 = vmatpush3.bf16.msra.mxu1 %v457_v11  ;;  %432 = vmatpush3.bf16.msra.mxu0 %v462_v16 }
  0x2c   :  { %419 = vmatprep.subr.bf16.mxu1 %v506_v1  ;;  %433 = vmatprep.subr.bf16.mxu0 %v506_v1 }
  0x2f   :  { %420 = vmatpush3.bf16.msra.mxu1 %v458_v12  ;;  %434 = vmatpush3.bf16.msra.mxu0 %v463_v17 }
  0x30   :  { %435 = vmatprep.subr.bf16.mxu0 %v506_v1 }
  0x33   :  { %436 = vmatpush3.bf16.msra.mxu0 %v464_v18 }
  0x34   :  { %437 = vmatprep.subr.bf16.mxu0 %v506_v1 }
  0x37   :  { %438 = vmatpush3.bf16.msra.mxu0 %v465_v29 }
  0x38   :  { %439 = vmatprep.subr.bf16.mxu0 %v506_v1 }
  0x3b   :  { %440 = vmatpush3.bf16.msra.mxu0 %v466_v30 }
  0xeb   :  { %v98_v20 = vpop.f32.mrb[0].mxu0 }
  0xec   :  { %v99_v22 = vadd.f32 %v353_v19, %v98_v20  ;;  %v403_v23 = vpop.f32.mrb[1].mxu0 }
  0xed   :  { %v101_v24 = vpop.f32.mrb[2].mxu0 }
  0xee   :  { %vm104_vm2 = vcmp.ge.f32.partialorder %v99_v22, 0.0  ;;  %v107_v25 = vmul.f32 %v106_v21, %v99_v22  ;;  %v404_v26 = vpop.f32.mrb[3].mxu0 }
  0xf0   :  { %v108_v27 = vsel %vm104_vm2, %v99_v22, %v107_v25 }
  0xf1   :  { %v109_v28 = vpack.c.bf16 %v108_v27, %v108_v27 }
  0xf3   :  { %422 = vmatmul.mubr.bf16.vlgmr.msra.gmra.mrb[0].mxu1 %v109_v28 }
 0x1c6   :  { %v215_v32 = vpop.f32.mrb[0].mxu1 }
 0x1c7   :  { %v216_v34 = vadd.f32 %v357_v31, %v215_v32  ;;  %v423_v35 = vpop.f32.mrb[1].mxu1 }
 0x1c8   :  { %v218_v36 = vpop.f32.mrb[2].mxu1 }
 0x1c9   :  { %vm221_vm3 = vcmp.ge.f32.partialorder %v216_v34, 0.0  ;;  %v224_v37 = vmul.f32 %v223_v33, %v216_v34  ;;  %v424_v38 = vpop.f32.mrb[3].mxu1 }
 0x1cb   :  { %v225_v39 = vsel %vm221_vm3, %v216_v34, %v224_v37 }
 0x1cc   :  { %v226_v40 = vpack.c.bf16 %v225_v39, %v225_v39 }
 0x1ce   :  { %442 = vmatmul.mubr.bf16.vlgmr.msra.gmra.mrb[4].mxu0 %v226_v40 }
 0x2a1   :  { %v332_v42 = vpop.f32.mrb[4].mxu0 }
 0x2a2   :  { %v333_v43 = vadd.f32 %v367_v41, %v332_v42  ;;  %v443_v44 = vpop.f32.mrb[5].mxu0 }
 0x2a3   :  { %v335_v45 = vpop.f32.mrb[6].mxu0 }
 0x2a4   :  { %338 = vst [vmem:[#allocation4] sm:$0xff] %v333_v43  ;;  %v444_v46 = vpop.f32.mrb[7].mxu0 }
 0x2a5   :  { %490 = shalt.err (!%p487_p9)
}
 0x2a6   :  { %s491_s7 = scalar_lea.hbm %s667_s8, 128 }
 0x2a7   :  { %p492_p10 = scmp.ne.s32.totalorder %s667_s8, %s491_s7  ;;  %p495_p11 = scmp.lt.u32.totalorder %s491_s7, %s667_s8 }
 0x2a9   :  { %p497_p12 = pnand %p495_p11, %p492_p10 }
 0x2ab   :  { %500 = shalt.err (!%p497_p12)
}
 0x2ac   :  { %348 = dma.vmem_to_hbm [thread:$0]  %s346_s26, 128, %s667_s8, [#allocation5]  }
 0x2ad   :  { %503 = dma.done.wait [#allocation5], 128  }
 0x2ae   :  { %504 = vsyncadd [#allocation5], 4294967168 }
 0x2af   :  { %352 = vsyncpa [#allocation5], 1 }

</bundles_post_ra>
